<compile_context>
chip_gen: v5e
topology: v5e:2x2
jax: 0.10.0
libtpu: 0.0.40
codegen_flags: <defaults>
</compile_context>

<pallas_src>
import functools

import jax
import jax.numpy as jnp
from jax.experimental import pallas as pl
from jax.experimental.pallas import tpu as pltpu

LEAKY_SLOPE = 0.01   # PyTorch nn.LeakyReLU() default
_MAX_TILE = 4096     # lane-axis tile cap; per-tile I/O is tiny vs. VMEM on all gens


def _leaky_relu(v):
    # max(v, a*v) == LeakyReLU(v) for 0 < a < 1 and finite v.
    return jnp.maximum(v, LEAKY_SLOPE * v)


def _forward_mlp_kernel(st_ref, at_ref,
                        w1s_ref, w1a_ref, b1_ref,
                        w2_ref, b2_ref,
                        w3_ref, b3_ref,
                        w4_ref, b4_ref,
                        w5_ref, b5_ref,
                        out_ref):
    """One lane-dense batch tile, transposed (features-on-sublanes) orientation.

    st_ref : [S, Bt]   operand dtype (f32 or bf16)
    at_ref : [A, Bt]
    w*_ref : torch-layout [out, in] weights, operand dtype
    b*_ref : [out, 1] biases, f32
    out_ref: [S, Bt]   original I/O dtype
    """
    op_dtype = w2_ref.dtype

    def layer(h_f32, w_ref, b_ref, activate=True):
        y = jnp.dot(w_ref[...], h_f32.astype(op_dtype),
                    preferred_element_type=jnp.float32) + b_ref[...]
        return _leaky_relu(y) if activate else y

    # Layer 1: concat([state, action]) folded into two partial dots.
    h = _leaky_relu(
        jnp.dot(w1s_ref[...], st_ref[...], preferred_element_type=jnp.float32)
        + jnp.dot(w1a_ref[...], at_ref[...], preferred_element_type=jnp.float32)
        + b1_ref[...])
    h = layer(h, w2_ref, b2_ref)
    h = layer(h, w3_ref, b3_ref)
    h = layer(h, w4_ref, b4_ref)
    y = layer(h, w5_ref, b5_ref, activate=False)

    out_ref[...] = y.astype(out_ref.dtype)


def _num_tensorcores_per_chip():
    """Best-effort detection: only v7x (2 TCs/chip) benefits from splitting."""
    try:
        kind = jax.devices()[0].device_kind.lower()
        if "v7" in kind:
            return 2
    except Exception:
        pass
    return 1


def _select_tiling(B, batch_tile, num_tc):
    """Returns (tile, n_tiles, lane_pad).

    Invariant: either n_tiles == 1 and tile == B (full-array lane block, no
    (8,128) divisibility requirement), or tile is a multiple of 128.
    """
    if batch_tile is not None:
        if batch_tile >= B:
            return B, 1, 0
        tile = max(128, ((batch_tile + 127) // 128) * 128)
    elif num_tc >= 2 and B >= 256:
        # v7x: largest 128-multiple divisor of B giving an EVEN tile count so
        # the "parallel" batch axis splits evenly across both TensorCores.
        tile = None
        t = (min(B // 2, _MAX_TILE) // 128) * 128
        while t >= 128:
            if B % t == 0 and (B // t) % 2 == 0:
                tile = t
                break
            t -= 128
        if tile is None:
            tile = B if B <= _MAX_TILE else _MAX_TILE
    else:
        # v5e / v6e (single TC): one grid step over the whole batch if it fits.
        tile = B if B <= _MAX_TILE else _MAX_TILE

    if tile >= B:
        return B, 1, 0
    n = pl.cdiv(B, tile)
    return tile, n, n * tile - B


@functools.partial(jax.jit, static_argnames=("batch_tile", "operand_dtype"))
def forward_model_robotic(state, action, params, *, batch_tile=None,
                          operand_dtype=None):
    """ForwardModel.forward for ARCH.robotic.

    state:  [B, input_shape]
    action: [B, action_dim]
    params: dict with torch-layout weights w1..w5 ([out, in]) and biases b1..b5.
    returns predicted_state: [B, input_shape], dtype = state.dtype
    """
    B, S = state.shape
    A = action.shape[-1]
    out_dtype = state.dtype
    op_dtype = jnp.dtype(operand_dtype) if operand_dtype is not None else state.dtype

    tile, n_tiles, pad = _select_tiling(B, batch_tile, _num_tensorcores_per_chip())
    B_pad = B + pad

    # Transposed, lane-dense operands (batch on the 128-lane axis). This is
    # pure layout plumbing in the wrapper; the kernel output is a lane-dense
    # [S, B] slab.
    state_t = state.T.astype(op_dtype)
    action_t = action.T.astype(op_dtype)
    if pad:
        # Fallback only (huge / explicitly-tiled awkward batches).
        state_t = jnp.pad(state_t, ((0, 0), (0, pad)))
        action_t = jnp.pad(action_t, ((0, 0), (0, pad)))

    # Torch [out, in] weights; W1 split so the concat folds into the kernel.
    # Biases stay f32 (added post-accumulation).
    w1 = params["w1"].astype(op_dtype)
    w1s, w1a = w1[:, :S], w1[:, S:]
    ws = [params[f"w{i}"].astype(op_dtype) for i in (2, 3, 4, 5)]
    bs = [params[f"b{i}"].reshape(-1, 1).astype(jnp.float32) for i in (1, 2, 3, 4, 5)]

    def full_spec(arr):
        # Whole-array block, same block every grid step -> DMA'd once and kept
        # VMEM-resident across the batch loop.
        ndim = arr.ndim
        return pl.BlockSpec(arr.shape, lambda i, _n=ndim: (0,) * _n)

    in_specs = [
        pl.BlockSpec((S, tile), lambda i: (0, i)),
        pl.BlockSpec((A, tile), lambda i: (0, i)),
        full_spec(w1s), full_spec(w1a), full_spec(bs[0]),
        full_spec(ws[0]), full_spec(bs[1]),
        full_spec(ws[1]), full_spec(bs[2]),
        full_spec(ws[2]), full_spec(bs[3]),
        full_spec(ws[3]), full_spec(bs[4]),
    ]

    out_t = pl.pallas_call(
        _forward_mlp_kernel,
        out_shape=jax.ShapeDtypeStruct((S, B_pad), out_dtype),
        grid_spec=pltpu.PrefetchScalarGridSpec(
            num_scalar_prefetch=0,
            grid=(n_tiles,),
            in_specs=in_specs,
            out_specs=pl.BlockSpec((S, tile), lambda i: (0, i)),
        ),
        compiler_params=pltpu.CompilerParams(
            dimension_semantics=("parallel",)),
    )(state_t, action_t,
      w1s, w1a, bs[0], ws[0], bs[1], ws[1], bs[2], ws[2], bs[3], ws[3], bs[4])

    if pad:
        out_t = out_t[:, :B]
    return out_t.T


def init_params(key, input_shape, action_dim, h1, h2):
    """Parameter init mirroring the module: torch-layout weights [out, in].

    xavier_uniform for layers 1-4, U(-0.3, 0.3) for the last layer, torch's
    default U(-1/sqrt(fan_in), 1/sqrt(fan_in)) for biases.
    """
    dims = [
        (input_shape + action_dim, h1),
        (h1, h1),
        (h1, h2),
        (h2, h2),
        (h2, input_shape),
    ]
    params = {}
    keys = jax.random.split(key, 2 * len(dims))
    for idx, (fan_in, fan_out) in enumerate(dims):
        wk, bk = keys[2 * idx], keys[2 * idx + 1]
        if idx < len(dims) - 1:
            limit = (6.0 / (fan_in + fan_out)) ** 0.5  # xavier_uniform
        else:
            limit = 0.3                                 # uniform_(-0.3, 0.3)
        w = jax.random.uniform(wk, (fan_out, fan_in), jnp.float32, -limit, limit)
        b_limit = 1.0 / (fan_in ** 0.5)
        b = jax.random.uniform(bk, (fan_out,), jnp.float32, -b_limit, b_limit)
        params[f"w{idx + 1}"] = w
        params[f"b{idx + 1}"] = b
    return params


def reference_forward(state, action, params):
    """Pure-JAX reference with torch-layout weights (x @ W^T + b)."""
    x = jnp.concatenate([state, action], axis=-1)
    h = _leaky_relu(x @ params["w1"].T + params["b1"])
    h = _leaky_relu(h @ params["w2"].T + params["b2"])
    h = _leaky_relu(h @ params["w3"].T + params["b3"])
    h = _leaky_relu(h @ params["w4"].T + params["b4"])
    return h @ params["w5"].T + params["b5"]


if __name__ == "__main__":
    # Small shapes consistent with the robotic arch.
    INPUT_SHAPE = 16   # state dim
    ACTION_DIM = 4
    H1 = 32            # config.forward_model_h1
    H2 = 32            # config.forward_model_h2

    key = jax.random.PRNGKey(0)
    k_state, k_action, k_params = jax.random.split(key, 3)
    params = init_params(k_params, INPUT_SHAPE, ACTION_DIM, H1, H2)

    # Case 1: tiny batch, auto tiling (single full-batch lane block, grid=1).
    B1 = 8
    state1 = jax.random.normal(k_state, (B1, INPUT_SHAPE), jnp.float32)
    action1 = jax.random.normal(k_action, (B1, ACTION_DIM), jnp.float32)
    pred1 = jax.block_until_ready(forward_model_robotic(state1, action1, params))
    ref1 = reference_forward(state1, action1, params)
    assert pred1.shape == (B1, INPUT_SHAPE)
    assert jnp.allclose(pred1, ref1, atol=1e-4, rtol=1e-4)

    # Case 2: batch not a multiple of 8/128 -> still one full block, no pad pass.
    B2 = 12
    state2 = jax.random.normal(jax.random.fold_in(k_state, 1),
                               (B2, INPUT_SHAPE), jnp.float32)
    action2 = jax.random.normal(jax.random.fold_in(k_action, 1),
                                (B2, ACTION_DIM), jnp.float32)
    pred2 = jax.block_until_ready(forward_model_robotic(state2, action2, params))
    ref2 = reference_forward(state2, action2, params)
    assert pred2.shape == (B2, INPUT_SHAPE)
    assert jnp.allclose(pred2, ref2, atol=1e-4, rtol=1e-4)

    # Case 3: larger batch with explicit 128-wide lane tiles (grid=4, parallel).
    B3 = 512
    state3 = jax.random.normal(jax.random.fold_in(k_state, 2),
                               (B3, INPUT_SHAPE), jnp.float32)
    action3 = jax.random.normal(jax.random.fold_in(k_action, 2),
                                (B3, ACTION_DIM), jnp.float32)
    pred3 = jax.block_until_ready(
        forward_model_robotic(state3, action3, params, batch_tile=128))
    ref3 = reference_forward(state3, action3, params)
    assert pred3.shape == (B3, INPUT_SHAPE)
    assert jnp.allclose(pred3, ref3, atol=1e-4, rtol=1e-4)

    # Case 4: bf16 I/O -> bf16 MXU operands, f32 accumulation + activations.
    B4 = 256
    state4 = jax.random.normal(jax.random.fold_in(k_state, 3),
                               (B4, INPUT_SHAPE), jnp.float32)
    action4 = jax.random.normal(jax.random.fold_in(k_action, 3),
                                (B4, ACTION_DIM), jnp.float32)
    state4_bf = state4.astype(jnp.bfloat16)
    action4_bf = action4.astype(jnp.bfloat16)
    pred4 = jax.block_until_ready(
        forward_model_robotic(state4_bf, action4_bf, params))
    ref4 = reference_forward(state4_bf.astype(jnp.float32),
                             action4_bf.astype(jnp.float32), params)
    assert pred4.shape == (B4, INPUT_SHAPE)
    assert pred4.dtype == jnp.bfloat16
    assert jnp.allclose(pred4.astype(jnp.float32), ref4, atol=5e-2, rtol=5e-2)

    print("KERNEL_OK")
</pallas_src>

<mosaic_0001>
module attributes {stable_mosaic.version = 11 : i64} {
  func.func @_forward_mlp_kernel(%arg0: i32, %arg1: memref<16x8xf32, #tpu.memory_space<vmem>>, %arg2: memref<4x8xf32, #tpu.memory_space<vmem>>, %arg3: memref<32x16xf32, #tpu.memory_space<vmem>>, %arg4: memref<32x4xf32, #tpu.memory_space<vmem>>, %arg5: memref<32x1xf32, #tpu.memory_space<vmem>>, %arg6: memref<32x32xf32, #tpu.memory_space<vmem>>, %arg7: memref<32x1xf32, #tpu.memory_space<vmem>>, %arg8: memref<32x32xf32, #tpu.memory_space<vmem>>, %arg9: memref<32x1xf32, #tpu.memory_space<vmem>>, %arg10: memref<32x32xf32, #tpu.memory_space<vmem>>, %arg11: memref<32x1xf32, #tpu.memory_space<vmem>>, %arg12: memref<16x32xf32, #tpu.memory_space<vmem>>, %arg13: memref<16x1xf32, #tpu.memory_space<vmem>>, %arg14: memref<16x8xf32, #tpu.memory_space<vmem>>) attributes {dimension_semantics = [#tpu.dimension_semantics<parallel>], iteration_bounds = array<i64: 1>, scalar_prefetch = 0 : i64, scratch_operands = 0 : i64, tpu.core_type = #tpu.core_type<tc>, window_params = [{transform_indices = @transform_0, window_bounds = array<i64: 16, 8>}, {transform_indices = @transform_1, window_bounds = array<i64: 4, 8>}, {pipeline_mode = #tpu.pipeline_mode<synchronous>, transform_indices = @transform_2, window_bounds = array<i64: 32, 16>}, {pipeline_mode = #tpu.pipeline_mode<synchronous>, transform_indices = @transform_3, window_bounds = array<i64: 32, 4>}, {pipeline_mode = #tpu.pipeline_mode<synchronous>, transform_indices = @transform_4, window_bounds = array<i64: 32, 1>}, {pipeline_mode = #tpu.pipeline_mode<synchronous>, transform_indices = @transform_5, window_bounds = array<i64: 32, 32>}, {pipeline_mode = #tpu.pipeline_mode<synchronous>, transform_indices = @transform_6, window_bounds = array<i64: 32, 1>}, {pipeline_mode = #tpu.pipeline_mode<synchronous>, transform_indices = @transform_7, window_bounds = array<i64: 32, 32>}, {pipeline_mode = #tpu.pipeline_mode<synchronous>, transform_indices = @transform_8, window_bounds = array<i64: 32, 1>}, {pipeline_mode = #tpu.pipeline_mode<synchronous>, transform_indices = @transform_9, window_bounds = array<i64: 32, 32>}, {pipeline_mode = #tpu.pipeline_mode<synchronous>, transform_indices = @transform_10, window_bounds = array<i64: 32, 1>}, {pipeline_mode = #tpu.pipeline_mode<synchronous>, transform_indices = @transform_11, window_bounds = array<i64: 16, 32>}, {pipeline_mode = #tpu.pipeline_mode<synchronous>, transform_indices = @transform_12, window_bounds = array<i64: 16, 1>}, {transform_indices = @transform_13, window_bounds = array<i64: 16, 8>}]} {
    %c0 = arith.constant 0 : index
    %c0_0 = arith.constant 0 : index
    %0 = vector.load %arg3[%c0, %c0_0] : memref<32x16xf32, #tpu.memory_space<vmem>>, vector<32x16xf32>
    %c0_1 = arith.constant 0 : index
    %c0_2 = arith.constant 0 : index
    %1 = vector.load %arg1[%c0_1, %c0_2] : memref<16x8xf32, #tpu.memory_space<vmem>>, vector<16x8xf32>
    %cst = arith.constant dense<0.000000e+00> : vector<32x8xf32>
    %2 = tpu.matmul %0, %1, %cst {dimension_numbers = #tpu.dot_dimension_numbers<[1], [0], [0], [1], [0, 0, 1, 1], [], []>} : vector<32x16xf32>, vector<16x8xf32>, vector<32x8xf32> -> vector<32x8xf32>
    %c0_3 = arith.constant 0 : index
    %c0_4 = arith.constant 0 : index
    %3 = vector.load %arg4[%c0_3, %c0_4] : memref<32x4xf32, #tpu.memory_space<vmem>>, vector<32x4xf32>
    %c0_5 = arith.constant 0 : index
    %c0_6 = arith.constant 0 : index
    %4 = vector.load %arg2[%c0_5, %c0_6] : memref<4x8xf32, #tpu.memory_space<vmem>>, vector<4x8xf32>
    %cst_7 = arith.constant dense<0.000000e+00> : vector<32x8xf32>
    %5 = tpu.matmul %3, %4, %cst_7 {dimension_numbers = #tpu.dot_dimension_numbers<[1], [0], [0], [1], [0, 0, 1, 1], [], []>} : vector<32x4xf32>, vector<4x8xf32>, vector<32x8xf32> -> vector<32x8xf32>
    %6 = arith.addf %2, %5 : vector<32x8xf32>
    %c0_8 = arith.constant 0 : index
    %c0_9 = arith.constant 0 : index
    %7 = vector.load %arg5[%c0_8, %c0_9] : memref<32x1xf32, #tpu.memory_space<vmem>>, vector<32x1xf32>
    %8 = vector.broadcast %7 : vector<32x1xf32> to vector<32x8xf32>
    %9 = arith.addf %6, %8 : vector<32x8xf32>
    %cst_10 = arith.constant 0.00999999977 : f32
    %10 = vector.broadcast %cst_10 : f32 to vector<32x8xf32>
    %11 = arith.mulf %10, %9 : vector<32x8xf32>
    %12 = arith.maximumf %9, %11 : vector<32x8xf32>
    %c0_11 = arith.constant 0 : index
    %c0_12 = arith.constant 0 : index
    %13 = vector.load %arg6[%c0_11, %c0_12] : memref<32x32xf32, #tpu.memory_space<vmem>>, vector<32x32xf32>
    %cst_13 = arith.constant dense<0.000000e+00> : vector<32x8xf32>
    %14 = tpu.matmul %13, %12, %cst_13 {dimension_numbers = #tpu.dot_dimension_numbers<[1], [0], [0], [1], [0, 0, 1, 1], [], []>} : vector<32x32xf32>, vector<32x8xf32>, vector<32x8xf32> -> vector<32x8xf32>
    %c0_14 = arith.constant 0 : index
    %c0_15 = arith.constant 0 : index
    %15 = vector.load %arg7[%c0_14, %c0_15] : memref<32x1xf32, #tpu.memory_space<vmem>>, vector<32x1xf32>
    %16 = vector.broadcast %15 : vector<32x1xf32> to vector<32x8xf32>
    %17 = arith.addf %14, %16 : vector<32x8xf32>
    %cst_16 = arith.constant 0.00999999977 : f32
    %18 = vector.broadcast %cst_16 : f32 to vector<32x8xf32>
    %19 = arith.mulf %18, %17 : vector<32x8xf32>
    %20 = arith.maximumf %17, %19 : vector<32x8xf32>
    %c0_17 = arith.constant 0 : index
    %c0_18 = arith.constant 0 : index
    %21 = vector.load %arg8[%c0_17, %c0_18] : memref<32x32xf32, #tpu.memory_space<vmem>>, vector<32x32xf32>
    %cst_19 = arith.constant dense<0.000000e+00> : vector<32x8xf32>
    %22 = tpu.matmul %21, %20, %cst_19 {dimension_numbers = #tpu.dot_dimension_numbers<[1], [0], [0], [1], [0, 0, 1, 1], [], []>} : vector<32x32xf32>, vector<32x8xf32>, vector<32x8xf32> -> vector<32x8xf32>
    %c0_20 = arith.constant 0 : index
    %c0_21 = arith.constant 0 : index
    %23 = vector.load %arg9[%c0_20, %c0_21] : memref<32x1xf32, #tpu.memory_space<vmem>>, vector<32x1xf32>
    %24 = vector.broadcast %23 : vector<32x1xf32> to vector<32x8xf32>
    %25 = arith.addf %22, %24 : vector<32x8xf32>
    %cst_22 = arith.constant 0.00999999977 : f32
    %26 = vector.broadcast %cst_22 : f32 to vector<32x8xf32>
    %27 = arith.mulf %26, %25 : vector<32x8xf32>
    %28 = arith.maximumf %25, %27 : vector<32x8xf32>
    %c0_23 = arith.constant 0 : index
    %c0_24 = arith.constant 0 : index
    %29 = vector.load %arg10[%c0_23, %c0_24] : memref<32x32xf32, #tpu.memory_space<vmem>>, vector<32x32xf32>
    %cst_25 = arith.constant dense<0.000000e+00> : vector<32x8xf32>
    %30 = tpu.matmul %29, %28, %cst_25 {dimension_numbers = #tpu.dot_dimension_numbers<[1], [0], [0], [1], [0, 0, 1, 1], [], []>} : vector<32x32xf32>, vector<32x8xf32>, vector<32x8xf32> -> vector<32x8xf32>
    %c0_26 = arith.constant 0 : index
    %c0_27 = arith.constant 0 : index
    %31 = vector.load %arg11[%c0_26, %c0_27] : memref<32x1xf32, #tpu.memory_space<vmem>>, vector<32x1xf32>
    %32 = vector.broadcast %31 : vector<32x1xf32> to vector<32x8xf32>
    %33 = arith.addf %30, %32 : vector<32x8xf32>
    %cst_28 = arith.constant 0.00999999977 : f32
    %34 = vector.broadcast %cst_28 : f32 to vector<32x8xf32>
    %35 = arith.mulf %34, %33 : vector<32x8xf32>
    %36 = arith.maximumf %33, %35 : vector<32x8xf32>
    %c0_29 = arith.constant 0 : index
    %c0_30 = arith.constant 0 : index
    %37 = vector.load %arg12[%c0_29, %c0_30] : memref<16x32xf32, #tpu.memory_space<vmem>>, vector<16x32xf32>
    %cst_31 = arith.constant dense<0.000000e+00> : vector<16x8xf32>
    %38 = tpu.matmul %37, %36, %cst_31 {dimension_numbers = #tpu.dot_dimension_numbers<[1], [0], [0], [1], [0, 0, 1, 1], [], []>} : vector<16x32xf32>, vector<32x8xf32>, vector<16x8xf32> -> vector<16x8xf32>
    %c0_32 = arith.constant 0 : index
    %c0_33 = arith.constant 0 : index
    %39 = vector.load %arg13[%c0_32, %c0_33] : memref<16x1xf32, #tpu.memory_space<vmem>>, vector<16x1xf32>
    %40 = vector.broadcast %39 : vector<16x1xf32> to vector<16x8xf32>
    %41 = arith.addf %38, %40 : vector<16x8xf32>
    %c0_34 = arith.constant 0 : index
    %c0_35 = arith.constant 0 : index
    %42 = vector.load %arg14[%c0_34, %c0_35] : memref<16x8xf32, #tpu.memory_space<vmem>>, vector<16x8xf32>
    tpu.vector_store %arg14[%c0_34, %c0_35], %41 {strides = array<i32>} : memref<16x8xf32, #tpu.memory_space<vmem>>, vector<16x8xf32>,
    return
  }
  func.func @transform_0(%arg0: i32) -> (i32, i32) {
    %c0_i32 = arith.constant 0 : i32
    %c0_i32_0 = arith.constant 0 : i32
    return %c0_i32, %arg0 : i32, i32
  }
  func.func @transform_1(%arg0: i32) -> (i32, i32) {
    %c0_i32 = arith.constant 0 : i32
    %c0_i32_0 = arith.constant 0 : i32
    return %c0_i32, %arg0 : i32, i32
  }
  func.func @transform_2(%arg0: i32) -> (i32, i32) {
    %c0_i32 = arith.constant 0 : i32
    %c0_i32_0 = arith.constant 0 : i32
    %c0_i32_1 = arith.constant 0 : i32
    return %c0_i32, %c0_i32_0 : i32, i32
  }
  func.func @transform_3(%arg0: i32) -> (i32, i32) {
    %c0_i32 = arith.constant 0 : i32
    %c0_i32_0 = arith.constant 0 : i32
    %c0_i32_1 = arith.constant 0 : i32
    return %c0_i32, %c0_i32_0 : i32, i32
  }
  func.func @transform_4(%arg0: i32) -> (i32, i32) {
    %c0_i32 = arith.constant 0 : i32
    %c0_i32_0 = arith.constant 0 : i32
    %c0_i32_1 = arith.constant 0 : i32
    return %c0_i32, %c0_i32_0 : i32, i32
  }
  func.func @transform_5(%arg0: i32) -> (i32, i32) {
    %c0_i32 = arith.constant 0 : i32
    %c0_i32_0 = arith.constant 0 : i32
    %c0_i32_1 = arith.constant 0 : i32
    return %c0_i32, %c0_i32_0 : i32, i32
  }
  func.func @transform_6(%arg0: i32) -> (i32, i32) {
    %c0_i32 = arith.constant 0 : i32
    %c0_i32_0 = arith.constant 0 : i32
    %c0_i32_1 = arith.constant 0 : i32
    return %c0_i32, %c0_i32_0 : i32, i32
  }
  func.func @transform_7(%arg0: i32) -> (i32, i32) {
    %c0_i32 = arith.constant 0 : i32
    %c0_i32_0 = arith.constant 0 : i32
    %c0_i32_1 = arith.constant 0 : i32
    return %c0_i32, %c0_i32_0 : i32, i32
  }
  func.func @transform_8(%arg0: i32) -> (i32, i32) {
    %c0_i32 = arith.constant 0 : i32
    %c0_i32_0 = arith.constant 0 : i32
    %c0_i32_1 = arith.constant 0 : i32
    return %c0_i32, %c0_i32_0 : i32, i32
  }
  func.func @transform_9(%arg0: i32) -> (i32, i32) {
    %c0_i32 = arith.constant 0 : i32
    %c0_i32_0 = arith.constant 0 : i32
    %c0_i32_1 = arith.constant 0 : i32
    return %c0_i32, %c0_i32_0 : i32, i32
  }
  func.func @transform_10(%arg0: i32) -> (i32, i32) {
    %c0_i32 = arith.constant 0 : i32
    %c0_i32_0 = arith.constant 0 : i32
    %c0_i32_1 = arith.constant 0 : i32
    return %c0_i32, %c0_i32_0 : i32, i32
  }
  func.func @transform_11(%arg0: i32) -> (i32, i32) {
    %c0_i32 = arith.constant 0 : i32
    %c0_i32_0 = arith.constant 0 : i32
    %c0_i32_1 = arith.constant 0 : i32
    return %c0_i32, %c0_i32_0 : i32, i32
  }
  func.func @transform_12(%arg0: i32) -> (i32, i32) {
    %c0_i32 = arith.constant 0 : i32
    %c0_i32_0 = arith.constant 0 : i32
    %c0_i32_1 = arith.constant 0 : i32
    return %c0_i32, %c0_i32_0 : i32, i32
  }
  func.func @transform_13(%arg0: i32) -> (i32, i32) {
    %c0_i32 = arith.constant 0 : i32
    %c0_i32_0 = arith.constant 0 : i32
    return %c0_i32, %arg0 : i32, i32
  }
}

</mosaic_0001>

<bundles_post_ra>
// kernel: forward_model_robotic.1
= control target key start
LH: loop header
LB: loop body
LE: loop exit
PB: predicated region body
PF: predicated region fallthrough
CT: control target
= control target key end

     0   :  { %vm68_vm0 = vcmask 1043456   ;;  %v493_v0 = vmov 0   ;;  %vm55_vm1 = vcmask 31744   ;;  %vm101_vm2 = vcmask 130048   ;;  %s723_s4 = inlined_call_operand.vmem [shape: f32[32,1], index: 4, kind: input, shape index: {}]   ;;  %s724_s0 = inlined_call_operand.vmem [shape: f32[16,8], index: 0, kind: input, shape index: {}]   ;;  %s725_s1 = inlined_call_operand.vmem [shape: f32[4,8], index: 1, kind: input, shape index: {}]   ;;  %s726_s3 = inlined_call_operand.vmem [shape: f32[32,4], index: 3, kind: input, shape index: {}]   ;;  %s727_s2 = inlined_call_operand.vmem [shape: f32[32,16], index: 2, kind: input, shape index: {}]   ;;  %s728_s6 = inlined_call_operand.vmem [shape: f32[32,1], index: 6, kind: input, shape index: {}]   ;;  %s729_s8 = inlined_call_operand.vmem [shape: f32[32,1], index: 8, kind: input, shape index: {}]   ;;  %s730_s10 = inlined_call_operand.vmem [shape: f32[32,1], index: 10, kind: input, shape index: {}]   ;;  %s731_s12 = inlined_call_operand.vmem [shape: f32[16,1], index: 12, kind: input, shape index: {}]   ;;  %s732_s5 = inlined_call_operand.vmem [shape: f32[32,32], index: 5, kind: input, shape index: {}]   ;;  %s733_s7 = inlined_call_operand.vmem [shape: f32[32,32], index: 7, kind: input, shape index: {}]   ;;  %s734_s9 = inlined_call_operand.vmem [shape: f32[32,32], index: 9, kind: input, shape index: {}]   ;;  %s735_s11 = inlined_call_operand.vmem [shape: f32[16,32], index: 11, kind: input, shape index: {}]   ;;  %s736_s13 = inlined_call_operand.vmem [shape: f32[16,8], index: 13, kind: output, shape index: {}]  }
   0x1   :  { %491 = vset.pattern.permute.xlu1 %v493_v0  ;;  %490 = vset.pattern.permute.xlu0 %v493_v0  ;;  %v146_v1 = vld [vmem:[%s723_s4 + $0x18] sm:$0xff]  ;;  %v144_v2 = vld [vmem:[%s723_s4 + $0x8] sm:$0xff]  ;;  %v54_v4 = vld [vmem:[%s725_s1] sm:$0xf]  ;;  %vm207_vm3 = vcmask 261120   ;;  %vm454_vm4 = vcmask 64512  }
   0x2   :  { %v49_v3 = vld [vmem:[%s724_s0 + $0x8] sm:$0xff]  ;;  %164 = vperm.xlu0 %490, %v146_v1   ;;  %154 = vperm.xlu1 %491, %v144_v2   ;;  %v48_v5 = vld [vmem:[%s724_s0] sm:$0xff]  ;;  %v52_v8 = vld [vmem:[%s726_s3 + $0x10] sm:$0xff] }
   0x3   :  { %v50_v6 = vld [vmem:[%s726_s3] sm:$0xff]  ;;  %128 = vmatpush.msra.mxu1 %v49_v3  ;;  %461 = vmatpush.msk.msra.mxu0 %vm68_vm0, %v54_v4  ;;  %v145_v9 = vld [vmem:[%s723_s4 + $0x10] sm:$0xff]  ;;  %v51_v11 = vld [vmem:[%s726_s3 + $0x8] sm:$0xff] }
   0x4   :  { %v44_v7 = vld [vmem:[%s727_s2] sm:$0xff]  ;;  %462 = vmatmul.msk.f32.vlgmr.msra.gmra.mxu0 %vm55_vm1, %v50_v6  ;;  %484 = vmatpush.msk.msra.mxu2 %vm68_vm0, %v54_v4  ;;  %v53_v12 = vld [vmem:[%s726_s3 + $0x18] sm:$0xff]  ;;  %v45_v13 = vld [vmem:[%s727_s2 + $0x8] sm:$0xff] }
   0x5   :  { %129 = vmatpush.msra.mxu1 %v48_v5  ;;  %464 = vmatmul.msk.f32.vlgmr.msra.gmra.mxu2 %vm55_vm1, %v52_v8  ;;  %v143_v10 = vld [vmem:[%s723_s4] sm:$0xff]  ;;  %v184_v14 = vld [vmem:[%s728_s6 + $0x8] sm:$0xff]  ;;  %v46_v16 = vld [vmem:[%s727_s2 + $0x10] sm:$0xff] }
   0x6   :  { %466 = vmatmul.msk.f32.vlgmr.msra.gmra.mxu1 %vm101_vm2, %v44_v7  ;;  %492 = vset.pattern.permute.xlu2 %v493_v0  ;;  %v183_v15 = vld [vmem:[%s728_s6] sm:$0xff]  ;;  %v263_v17 = vld [vmem:[%s729_s8 + $0x10] sm:$0xff]  ;;  %v262_v18 = vld [vmem:[%s729_s8 + $0x8] sm:$0xff] }
   0x7   :  { %v47_v19 = vld [vmem:[%s727_s2 + $0x18] sm:$0xff]  ;;  %v340_v21 = vld [vmem:[%s730_s10 + $0x10] sm:$0xff]  ;;  %v338_v22 = vld [vmem:[%s730_s10] sm:$0xff] }
   0x8   :  { %v341_v20 = vld [vmem:[%s730_s10 + $0x18] sm:$0xff]  ;;  %v413_v23 = vld [vmem:[%s731_s12] sm:$0xff]  ;;  %v185_v49 = vld [vmem:[%s728_s6 + $0x10] sm:$0xff] }
   0x9   :  { %v186_v37 = vld [vmem:[%s728_s6 + $0x18] sm:$0xff]  ;;  %v179_v54 = vld [vmem:[%s732_s5] sm:$0xff]  ;;  %v180_v56 = vld [vmem:[%s732_s5 + $0x8] sm:$0xff] }
   0xa   :  { %159 = vperm.xlu0 %490, %v145_v9   ;;  %149 = vperm.xlu1 %491, %v143_v10   ;;  %v264_v55 = vld [vmem:[%s729_s8 + $0x18] sm:$0xff]  ;;  %v261_v57 = vld [vmem:[%s729_s8] sm:$0xff]  ;;  %v181_v58 = vld [vmem:[%s732_s5 + $0x10] sm:$0xff] }
   0xb   :  { %204 = vperm.xlu2 %492, %v186_v37   ;;  %v339_v59 = vld [vmem:[%s730_s10 + $0x8] sm:$0xff]  ;;  %v182_v60 = vld [vmem:[%s732_s5 + $0x18] sm:$0xff] }
   0xc   :  { %463 = vmatmul.msk.f32.gmra.mxu0 %vm55_vm1, %v51_v11  ;;  %v414_v61 = vld [vmem:[%s731_s12 + $0x8] sm:$0xff] }
   0xd   :  { %465 = vmatmul.msk.f32.gmra.mxu2 %vm55_vm1, %v53_v12 }
   0xe   :  { %467 = vmatmul.msk.f32.gmra.mxu1 %vm101_vm2, %v45_v13 }
  0x12   :  { %194 = vperm.xlu0 %490, %v184_v14   ;;  %189 = vperm.xlu1 %491, %v183_v15  }
  0x13   :  { %199 = vperm.xlu2 %492, %v185_v49  }
  0x16   :  { %468 = vmatmul.msk.f32.gmra.mxu1 %vm101_vm2, %v46_v16 }
  0x1a   :  { %277 = vperm.xlu0 %490, %v263_v17   ;;  %272 = vperm.xlu1 %491, %v262_v18   ;;  %v257_v18 = vld [vmem:[%s733_s7] sm:$0xff] }
  0x1b   :  { %282 = vperm.xlu2 %492, %v264_v55  }
  0x1e   :  { %469 = vmatmul.msk.f32.gmra.mxu1 %vm101_vm2, %v47_v19  ;;  %v258_v19 = vld [vmem:[%s733_s7 + $0x8] sm:$0xff] }
  0x22   :  { %359 = vperm.xlu0 %490, %v341_v20   ;;  %354 = vperm.xlu1 %491, %v340_v21   ;;  %v259_v20 = vld [vmem:[%s733_s7 + $0x10] sm:$0xff]  ;;  %v260_v21 = vld [vmem:[%s733_s7 + $0x18] sm:$0xff] }
  0x23   :  { %267 = vperm.xlu2 %492, %v261_v57  }
  0x2a   :  { %344 = vperm.xlu0 %490, %v338_v22   ;;  %417 = vperm.xlu1 %491, %v413_v23  }
  0x2b   :  { %349 = vperm.xlu2 %492, %v339_v59  }
  0x33   :  { %422 = vperm.xlu2 %492, %v414_v61  }
  0x65   :  { %v205_v0 = vpop.permute.xlu2 %204 }
  0x6d   :  { %v200_v2 = vpop.permute.xlu2 %199 }
  0x74   :  { %v165_v28 = vpop.permute.xlu0 %164  ;;  %v155_v30 = vpop.permute.xlu1 %154 }
  0x7c   :  { %v160_v35 = vpop.permute.xlu0 %159  ;;  %v150_v43 = vpop.permute.xlu1 %149 }
  0x81   :  { %v89_v26 = vpop.f32.mrf.mxu0 }
  0x83   :  { %v131_v24 = vpop.f32.mrf.mxu1 }
  0x84   :  { %v132_v38 = vadd.f32 %v131_v24, %v89_v26  ;;  %v195_v4 = vpop.permute.xlu0 %194  ;;  %v190_v8 = vpop.permute.xlu1 %189 }
  0x85   :  { %v283_v24 = vpop.permute.xlu2 %282 }
  0x86   :  { %v167_v44 = vadd.f32 %v150_v43, %v132_v38  ;;  %v335_v43 = vld [vmem:[%s734_s9 + $0x8] sm:$0xff] }
  0x88   :  { %v95_v27 = vpop.f32.mrf.mxu2  ;;  %v171_v51 = vmul.f32 0.01, %v167_v44 }
  0x89   :  { %v92_v31 = vpop.f32.mrf.mxu0 }
  0x8a   :  { %v175_v53 = vmax.f32 %v167_v44, %v171_v51  ;;  %v336_v44 = vld [vmem:[%s734_s9 + $0x10] sm:$0xff] }
  0x8b   :  { %v134_v25 = vpop.f32.mrf.mxu1 }
  0x8c   :  { %v135_v34 = vadd.f32 %v134_v25, %v92_v31  ;;  %v278_v26 = vpop.permute.xlu0 %277 }
  0x8e   :  { %v168_v41 = vadd.f32 %v155_v30, %v135_v34 }
  0x90   :  { %v98_v33 = vpop.f32.mrf.mxu2  ;;  %v172_v48 = vmul.f32 0.01, %v168_v41 }
  0x92   :  { %v176_v52 = vmax.f32 %v168_v41, %v172_v48 }
  0x93   :  { %v137_v29 = vpop.f32.mrf.mxu1 }
  0x94   :  { %v138_v32 = vadd.f32 %v137_v29, %v95_v27  ;;  %v360_v48 = vpop.permute.xlu0 %359 }
  0x96   :  { %v169_v39 = vadd.f32 %v160_v35, %v138_v32  ;;  %v268_v32 = vpop.permute.xlu2 %267 }
  0x98   :  { %v173_v46 = vmul.f32 0.01, %v169_v39 }
  0x9a   :  { %v177_v50 = vmax.f32 %v169_v39, %v173_v46 }
  0x9b   :  { %v140_v36 = vpop.f32.mrf.mxu1 }
  0x9c   :  { %v141_v40 = vadd.f32 %v140_v36, %v98_v33 }
  0x9e   :  { %v170_v42 = vadd.f32 %v165_v28, %v141_v40  ;;  %v273_v28 = vpop.permute.xlu1 %272 }
  0xa0   :  { %v174_v45 = vmul.f32 0.01, %v170_v42 }
  0xa2   :  { %v178_v47 = vmax.f32 %v170_v42, %v174_v45  ;;  %v334_v42 = vld [vmem:[%s734_s9] sm:$0xff]  ;;  %v337_v45 = vld [vmem:[%s734_s9 + $0x18] sm:$0xff] }
  0xa4   :  { %232 = vmatpush.msrb.mxu2 %v178_v47 }
  0xa6   :  { %233 = vmatpush.msrb.mxu2 %v177_v50  ;;  %v355_v50 = vpop.permute.xlu1 %354 }
  0xa8   :  { %234 = vmatpush.msrb.mxu2 %v176_v52  ;;  %v350_v52 = vpop.permute.xlu2 %349 }
  0xaa   :  { %235 = vmatpush.msrb.mxu2 %v175_v53 }
  0xab   :  { %470 = vmatmul.msk.f32.vlgmr.msrb.gmra.mxu2 %vm207_vm3, %v179_v54 }
  0xb3   :  { %471 = vmatmul.msk.f32.gmra.mxu2 %vm207_vm3, %v180_v56  ;;  %v345_v56 = vpop.permute.xlu0 %344 }
  0xbb   :  { %472 = vmatmul.msk.f32.gmra.mxu2 %vm207_vm3, %v181_v58 }
  0xc3   :  { %473 = vmatmul.msk.f32.gmra.mxu2 %vm207_vm3, %v182_v60 }
 0x12e   :  { %v237_v62 = vpop.f32.mrf.mxu2 }
 0x12f   :  { %v238_v9 = vadd.f32 %v237_v62, %v190_v8 }
 0x131   :  { %v249_v14 = vmul.f32 0.01, %v238_v9 }
 0x133   :  { %v253_v17 = vmax.f32 %v238_v9, %v249_v14 }
 0x136   :  { %v240_v63 = vpop.f32.mrf.mxu2 }
 0x137   :  { %v241_v6 = vadd.f32 %v240_v63, %v195_v4  ;;  %v418_v4 = vpop.permute.xlu1 %417 }
 0x139   :  { %v250_v12 = vmul.f32 0.01, %v241_v6 }
 0x13b   :  { %v254_v16 = vmax.f32 %v241_v6, %v250_v12 }
 0x13e   :  { %v243_v1 = vpop.f32.mrf.mxu2 }
 0x13f   :  { %v244_v3 = vadd.f32 %v243_v1, %v200_v2  ;;  %v411_v2 = vld [vmem:[%s735_s11] sm:$0xff] }
 0x141   :  { %v251_v10 = vmul.f32 0.01, %v244_v3 }
 0x143   :  { %v255_v15 = vmax.f32 %v244_v3, %v251_v10  ;;  %v412_v3 = vld [vmem:[%s735_s11 + $0x8] sm:$0xff] }
 0x146   :  { %v246_v5 = vpop.f32.mrf.mxu2 }
 0x147   :  { %v247_v7 = vadd.f32 %v246_v5, %v205_v0 }
 0x149   :  { %v252_v11 = vmul.f32 0.01, %v247_v7 }
 0x14b   :  { %v256_v13 = vmax.f32 %v247_v7, %v252_v11  ;;  %v423_v7 = vpop.permute.xlu2 %422 }
 0x14d   :  { %309 = vmatpush.msra.mxu3 %v256_v13 }
 0x14f   :  { %310 = vmatpush.msra.mxu3 %v255_v15 }
 0x151   :  { %311 = vmatpush.msra.mxu3 %v254_v16 }
 0x153   :  { %312 = vmatpush.msra.mxu3 %v253_v17 }
 0x154   :  { %474 = vmatmul.msk.f32.vlgmr.msra.gmra.mxu3 %vm207_vm3, %v257_v18 }
 0x15c   :  { %475 = vmatmul.msk.f32.gmra.mxu3 %vm207_vm3, %v258_v19 }
 0x164   :  { %476 = vmatmul.msk.f32.gmra.mxu3 %vm207_vm3, %v259_v20 }
 0x16c   :  { %477 = vmatmul.msk.f32.gmra.mxu3 %vm207_vm3, %v260_v21 }
 0x1d7   :  { %v314_v22 = vpop.f32.mrf.mxu3 }
 0x1d8   :  { %v315_v33 = vadd.f32 %v314_v22, %v268_v32 }
 0x1da   :  { %v326_v38 = vmul.f32 0.01, %v315_v33 }
 0x1dc   :  { %v330_v41 = vmax.f32 %v315_v33, %v326_v38 }
 0x1df   :  { %v317_v23 = vpop.f32.mrf.mxu3 }
 0x1e0   :  { %v318_v30 = vadd.f32 %v317_v23, %v273_v28 }
 0x1e2   :  { %v327_v36 = vmul.f32 0.01, %v318_v30 }
 0x1e4   :  { %v331_v40 = vmax.f32 %v318_v30, %v327_v36 }
 0x1e7   :  { %v320_v25 = vpop.f32.mrf.mxu3 }
 0x1e8   :  { %v321_v27 = vadd.f32 %v320_v25, %v278_v26 }
 0x1ea   :  { %v328_v34 = vmul.f32 0.01, %v321_v27 }
 0x1ec   :  { %v332_v39 = vmax.f32 %v321_v27, %v328_v34 }
 0x1ef   :  { %v323_v29 = vpop.f32.mrf.mxu3 }
 0x1f0   :  { %v324_v31 = vadd.f32 %v323_v29, %v283_v24 }
 0x1f2   :  { %v329_v35 = vmul.f32 0.01, %v324_v31 }
 0x1f4   :  { %v333_v37 = vmax.f32 %v324_v31, %v329_v35 }
 0x1f6   :  { %386 = vmatpush.msrb.mxu0 %v333_v37 }
 0x1f8   :  { %387 = vmatpush.msrb.mxu0 %v332_v39 }
 0x1fa   :  { %388 = vmatpush.msrb.mxu0 %v331_v40 }
 0x1fc   :  { %389 = vmatpush.msrb.mxu0 %v330_v41 }
 0x1fd   :  { %478 = vmatmul.msk.f32.vlgmr.msrb.gmra.mxu0 %vm207_vm3, %v334_v42 }
 0x205   :  { %479 = vmatmul.msk.f32.gmra.mxu0 %vm207_vm3, %v335_v43 }
 0x20d   :  { %480 = vmatmul.msk.f32.gmra.mxu0 %vm207_vm3, %v336_v44 }
 0x215   :  { %481 = vmatmul.msk.f32.gmra.mxu0 %vm207_vm3, %v337_v45 }
 0x27a   :  { %v391_v46 = vpop.f32.mrf.mxu0 }
 0x27b   :  { %v392_v57 = vadd.f32 %v391_v46, %v345_v56 }
 0x27d   :  { %v403_v62 = vmul.f32 0.01, %v392_v57 }
 0x27f   :  { %v407_v1 = vmax.f32 %v392_v57, %v403_v62 }
 0x282   :  { %v394_v47 = vpop.f32.mrf.mxu0 }
 0x283   :  { %v395_v54 = vadd.f32 %v394_v47, %v350_v52 }
 0x285   :  { %v404_v60 = vmul.f32 0.01, %v395_v54 }
 0x287   :  { %v408_v0 = vmax.f32 %v395_v54, %v404_v60 }
 0x28a   :  { %v397_v49 = vpop.f32.mrf.mxu0 }
 0x28b   :  { %v398_v51 = vadd.f32 %v397_v49, %v355_v50 }
 0x28d   :  { %v405_v58 = vmul.f32 0.01, %v398_v51 }
 0x28f   :  { %v409_v63 = vmax.f32 %v398_v51, %v405_v58 }
 0x292   :  { %v400_v53 = vpop.f32.mrf.mxu0 }
 0x293   :  { %v401_v55 = vadd.f32 %v400_v53, %v360_v48 }
 0x295   :  { %v406_v59 = vmul.f32 0.01, %v401_v55 }
 0x297   :  { %v410_v61 = vmax.f32 %v401_v55, %v406_v59 }
 0x299   :  { %443 = vmatpush.msrb.mxu1 %v410_v61  ;;  %485 = vmatpush.msrb.mxu3 %v410_v61 }
 0x29b   :  { %444 = vmatpush.msrb.mxu1 %v409_v63  ;;  %486 = vmatpush.msrb.mxu3 %v409_v63 }
 0x29d   :  { %445 = vmatpush.msrb.mxu1 %v408_v0  ;;  %487 = vmatpush.msrb.mxu3 %v408_v0 }
 0x29f   :  { %446 = vmatpush.msrb.mxu1 %v407_v1  ;;  %488 = vmatpush.msrb.mxu3 %v407_v1 }
 0x2a0   :  { %482 = vmatmul.msk.f32.vlgmr.msrb.gmra.mxu1 %vm207_vm3, %v411_v2  ;;  %483 = vmatmul.msk.f32.vlgmr.msrb.gmra.mxu3 %vm207_vm3, %v412_v3 }
 0x31d   :  { %v448_v5 = vpop.f32.mrf.mxu1 }
 0x31e   :  { %v449_v6 = vadd.f32 %v448_v5, %v418_v4 }
 0x320   :  { %455 = vst.msk [vmem:[%s736_s13] sm:$0xff] %vm454_vm4, %v449_v6 }
 0x323   :  { %v451_v8 = vpop.f32.mrf.mxu3 }
 0x324   :  { %v452_v9 = vadd.f32 %v451_v8, %v423_v7 }
 0x326   :  { %456 = vst.msk [vmem:[%s736_s13 + $0x8] sm:$0xff] %vm454_vm4, %v452_v9 }

</bundles_post_ra>
